<compile_context>
chip_gen: v7x
topology: tpu7x:2x2x1
jax: 0.10.0
libtpu: 0.0.40
codegen_flags: <defaults>
</compile_context>

<pallas_src>
import jax
import jax.numpy as jnp
from jax.experimental import pallas as pl
from jax.experimental.pallas import tpu as pltpu


def _round_up(x, m):
    return ((x + m - 1) // m) * m


def _vmem_limit_bytes():
    """Generation-aware VMEM limit with headroom for compiler scratch."""
    try:
        cap = int(pltpu.get_tpu_info().vmem_capacity_bytes)
    except Exception:
        cap = 64 * 1024 * 1024  # conservative fallback (v7x per-TC size)
    return max(32 * 1024 * 1024, min(int(cap * 0.7), 100 * 1024 * 1024))


# ----------------------------- kernel bodies ------------------------------
# x_ref: (tm, tk) activations (any float dtype; cast to MXU dtype in-kernel)
# w_ref: (tk, tn) weight, pre-transposed (K, N)-major, already bf16
# b_ref: (1,  tn) f32 bias
# o_ref: (tm, tn) output tile (block index constant across the K grid axis,
#                 so it is resident in VMEM across K steps)

def _linear_kernel_single_k(x_ref, w_ref, b_ref, o_ref):
    # Whole reduction dim fits in one block: no accumulator needed.
    acc = jnp.dot(x_ref[...].astype(w_ref.dtype), w_ref[...],
                  preferred_element_type=jnp.float32)
    o_ref[...] = (acc + b_ref[...]).astype(o_ref.dtype)


def _linear_kernel_acc_out(x_ref, w_ref, b_ref, o_ref):
    # f32 output: accumulate directly into the resident output block
    # (saves the scratch tile and the finalize copy).
    k = pl.program_id(2)

    @pl.when(k == 0)
    def _():
        o_ref[...] = jnp.zeros_like(o_ref)

    o_ref[...] += jnp.dot(x_ref[...].astype(w_ref.dtype), w_ref[...],
                          preferred_element_type=jnp.float32)

    @pl.when(k == pl.num_programs(2) - 1)
    def _():
        o_ref[...] += b_ref[...]


def _linear_kernel_scratch(x_ref, w_ref, b_ref, o_ref, acc_ref):
    # Narrow output dtype: accumulate in a resident f32 scratch.
    k = pl.program_id(2)

    @pl.when(k == 0)
    def _():
        acc_ref[...] = jnp.zeros_like(acc_ref)

    acc_ref[...] += jnp.dot(x_ref[...].astype(w_ref.dtype), w_ref[...],
                            preferred_element_type=jnp.float32)

    @pl.when(k == pl.num_programs(2) - 1)
    def _():
        o_ref[...] = (acc_ref[...] + b_ref[...]).astype(o_ref.dtype)


# ------------------------------- module -----------------------------------

class Generator:
    """Pallas-TPU equivalent of the PyTorch Generator (nn.Linear(d_model, n_pixels)).

    Weight is kept in PyTorch layout at the API boundary (n_pixels, d_model);
    it is transposed/padded/cast exactly once at construction time.
    """

    def __init__(self, weight, bias, *, tm_max=512, tn_max=1024, tk_max=1024,
                 compute_dtype=jnp.bfloat16):
        weight = jnp.asarray(weight)
        bias = jnp.asarray(bias)
        n_pixels, d_model = weight.shape
        assert bias.shape == (n_pixels,)

        self.n_pixels = int(n_pixels)
        self.d_model = int(d_model)
        self.tm_max = int(tm_max)
        self.compute_dtype = jnp.dtype(compute_dtype)
        self.vmem_limit = _vmem_limit_bytes()

        # ---- static tile choices for the weight-side dims (decided once) ----
        # Small dims use full-dim blocks (exempt from the (8,128) divisibility
        # rule) instead of padding 32->128 / 64->128.
        if d_model <= tk_max:
            tk, k_p = d_model, d_model
        else:
            tk = tk_max                       # multiple of 128
            k_p = _round_up(d_model, tk)
        if n_pixels <= tn_max:
            tn, n_p = n_pixels, n_pixels
        else:
            tn = tn_max                       # multiple of 128
            n_p = _round_up(n_pixels, tn)
        self.tk, self.k_p = int(tk), int(k_p)
        self.tn, self.n_p = int(tn), int(n_p)

        # ---- one-time weight/bias preparation (hoisted out of call path) ----
        # (K, N)-major layout so the kernel runs a plain contraction on the
        # MXU with no per-K-step transpose; padded + cast to bf16 once.
        w_t = weight.T
        if k_p != d_model or n_p != n_pixels:
            w_t = jnp.pad(w_t, ((0, k_p - d_model), (0, n_p - n_pixels)))
        self.w_t = w_t.astype(self.compute_dtype)

        b = bias.astype(jnp.float32)
        if n_p != n_pixels:
            b = jnp.pad(b, (0, n_p - n_pixels))
        self.b2d = b.reshape(1, n_p)

    def __call__(self, x):
        *lead, d_model = x.shape
        assert d_model == self.d_model
        out_dtype = jnp.dtype(x.dtype)
        m = 1
        for s in lead:
            m *= int(s)

        tn, tk = self.tn, self.tk
        n_p, k_p = self.n_p, self.k_p

        # ---- M tiling (full-dim block for small M; 16-aligned otherwise) ----
        if m <= self.tm_max:
            tm, m_p = m, m
        else:
            tm = self.tm_max                  # multiple of 16 (bf16-safe)
            m_p = _round_up(m, tm)

        # ---- guarantee >= 2 blocks on a parallel axis (v7x megacore) ----
        if (m_p // tm) == 1 and (n_p // tn) == 1:
            if tn % 256 == 0:
                tn //= 2                      # still a multiple of 128, divides n_p
            elif tm % 32 == 0:
                tm //= 2                      # still a multiple of 16, divides m_p
            # else: dims too small/odd to split -> single core handles it.

        # ---- shrink tiles if the double-buffered working set won't fit ----
        x_itemsize = jnp.dtype(x.dtype).itemsize
        cd_itemsize = self.compute_dtype.itemsize
        o_itemsize = out_dtype.itemsize

        def working_set(tm_, tn_, tk_):
            xs = tm_ * tk_ * x_itemsize
            ws = tk_ * tn_ * cd_itemsize
            bs = tn_ * 4
            os = tm_ * tn_ * o_itemsize
            acc = tm_ * tn_ * 4 if (k_p // tk_ > 1 and out_dtype != jnp.dtype(jnp.float32)) else 0
            return 2 * (xs + ws + bs + os) + acc

        budget = int(self.vmem_limit * 0.75)
        while working_set(tm, tn, tk) > budget:
            if tk % 256 == 0:
                tk //= 2
            elif tn % 256 == 0:
                tn //= 2
            elif tm % 32 == 0:
                tm //= 2
            else:
                break

        gm, gn, gk = m_p // tm, n_p // tn, k_p // tk
        grid = (gm, gn, gk)

        # ---- activations: only pad when strictly needed (no dtype cast) ----
        x2d = x.reshape(m, d_model)
        if m_p != m or k_p != d_model:
            x2d = jnp.pad(x2d, ((0, m_p - m), (0, k_p - d_model)))

        # ---- pick kernel variant ----
        if gk == 1:
            kernel = _linear_kernel_single_k
            scratch = []
        elif out_dtype == jnp.dtype(jnp.float32):
            kernel = _linear_kernel_acc_out
            scratch = []
        else:
            kernel = _linear_kernel_scratch
            scratch = [pltpu.VMEM((tm, tn), jnp.float32)]

        flops = 2 * m_p * n_p * k_p
        bytes_accessed = (m_p * k_p * x_itemsize * gn      # x re-read per N block
                          + k_p * n_p * cd_itemsize * gm   # W re-read per M block
                          + n_p * 4 * gm                   # bias re-read per M block
                          + m_p * n_p * o_itemsize)        # output written once

        out2d = pl.pallas_call(
            kernel,
            out_shape=jax.ShapeDtypeStruct((m_p, n_p), out_dtype),
            grid_spec=pltpu.PrefetchScalarGridSpec(
                num_scalar_prefetch=0,
                grid=grid,
                in_specs=[
                    pl.BlockSpec((tm, tk), lambda i, j, k: (i, k)),   # x   (M, K)
                    pl.BlockSpec((tk, tn), lambda i, j, k: (k, j)),   # W^T (K, N)
                    pl.BlockSpec((1, tn), lambda i, j, k: (0, j)),    # bias
                ],
                out_specs=pl.BlockSpec((tm, tn), lambda i, j, k: (i, j)),
                scratch_shapes=scratch,
            ),
            compiler_params=pltpu.CompilerParams(
                dimension_semantics=("parallel", "parallel", "arbitrary"),
                vmem_limit_bytes=self.vmem_limit,
            ),
            cost_estimate=pl.CostEstimate(
                flops=flops, transcendentals=0, bytes_accessed=bytes_accessed),
        )(x2d, self.w_t, self.b2d)

        if m_p != m or n_p != self.n_pixels:
            out2d = out2d[:m, :self.n_pixels]
        return out2d.reshape(*lead, self.n_pixels)


if __name__ == "__main__":
    key = jax.random.PRNGKey(0)

    # --- Test 1: tiny shapes from the module spec (single-K, full-dim blocks) ---
    batch, seq, d_model, n_pixels = 2, 8, 32, 64
    kx, kw, kb, k2x, k2w, k2b = jax.random.split(key, 6)

    bound = 1.0 / (d_model ** 0.5)
    weight = jax.random.uniform(kw, (n_pixels, d_model),
                                minval=-bound, maxval=bound, dtype=jnp.float32)
    bias = jax.random.uniform(kb, (n_pixels,),
                              minval=-bound, maxval=bound, dtype=jnp.float32)
    x = jax.random.normal(kx, (batch, seq, d_model), dtype=jnp.float32)

    gen = Generator(weight, bias)          # one-time weight prep (transpose/pad/cast)
    y = jax.block_until_ready(gen(x))
    assert y.shape == (batch, seq, n_pixels)

    # bf16-operand / f32-accumulate reference (tight tolerance)
    xq = x.astype(jnp.bfloat16).astype(jnp.float32)
    wq = weight.astype(jnp.bfloat16).astype(jnp.float32)
    y_ref_q = xq @ wq.T + bias
    assert jnp.allclose(y, y_ref_q, atol=1e-4, rtol=1e-4)

    # full-precision reference (loose tolerance = bf16 operand rounding)
    y_ref = x @ weight.T + bias
    assert jnp.allclose(y, y_ref, atol=5e-2, rtol=5e-2)

    # --- Test 2: exercise the K-grid > 1 paths (scratch and f32 acc-in-out) ---
    d2, n2, m2 = 256, 512, 64
    bound2 = 1.0 / (d2 ** 0.5)
    w2 = jax.random.uniform(k2w, (n2, d2), minval=-bound2, maxval=bound2,
                            dtype=jnp.float32)
    b2 = jax.random.uniform(k2b, (n2,), minval=-bound2, maxval=bound2,
                            dtype=jnp.float32)
    x2_f32 = jax.random.normal(k2x, (2, m2 // 2, d2), dtype=jnp.float32)
    x2_bf16 = x2_f32.astype(jnp.bfloat16)

    gen2 = Generator(w2, b2, tn_max=256, tk_max=128)   # grid = (1, 2, 2)
    ref2 = (x2_bf16.astype(jnp.float32).reshape(-1, d2)
            @ w2.astype(jnp.bfloat16).astype(jnp.float32).T + b2).reshape(2, m2 // 2, n2)

    y2_bf16 = jax.block_until_ready(gen2(x2_bf16))     # scratch-accumulator path
    assert y2_bf16.shape == (2, m2 // 2, n2)
    assert jnp.allclose(y2_bf16.astype(jnp.float32), ref2, atol=2e-2, rtol=2e-2)

    y2_f32 = jax.block_until_ready(gen2(x2_f32.astype(jnp.bfloat16).astype(jnp.float32)))
    assert y2_f32.dtype == jnp.float32                 # accumulate-into-output path
    assert jnp.allclose(y2_f32, ref2, atol=1e-3, rtol=1e-3)

    print("KERNEL_OK")
</pallas_src>

<mosaic_0001>
module attributes {stable_mosaic.version = 11 : i64} {
  func.func @_linear_kernel_single_k(%arg0: i32, %arg1: i32, %arg2: i32, %arg3: memref<16x32xf32, #tpu.memory_space<vmem>>, %arg4: memref<32x64xbf16, #tpu.memory_space<vmem>>, %arg5: memref<1x64xf32, #tpu.memory_space<vmem>>, %arg6: memref<16x64xf32, #tpu.memory_space<vmem>>) attributes {dimension_semantics = [#tpu.dimension_semantics<parallel>, #tpu.dimension_semantics<parallel>, #tpu.dimension_semantics<arbitrary>], iteration_bounds = array<i64: 1, 1, 1>, scalar_prefetch = 0 : i64, scratch_operands = 0 : i64, tpu.core_type = #tpu.core_type<tc>, window_params = [{transform_indices = @transform_0, window_bounds = array<i64: 16, 32>}, {transform_indices = @transform_1, window_bounds = array<i64: 32, 64>}, {transform_indices = @transform_2, window_bounds = array<i64: 1, 64>}, {transform_indices = @transform_3, window_bounds = array<i64: 16, 64>}]} {
    %c0 = arith.constant 0 : index
    %c0_0 = arith.constant 0 : index
    %0 = vector.load %arg3[%c0, %c0_0] : memref<16x32xf32, #tpu.memory_space<vmem>>, vector<16x32xf32>
    %1 = arith.truncf %0 : vector<16x32xf32> to vector<16x32xbf16>
    %c0_1 = arith.constant 0 : index
    %c0_2 = arith.constant 0 : index
    %2 = vector.load %arg4[%c0_1, %c0_2] : memref<32x64xbf16, #tpu.memory_space<vmem>>, vector<32x64xbf16>
    %cst = arith.constant dense<0.000000e+00> : vector<16x64xf32>
    %3 = tpu.matmul %1, %2, %cst {dimension_numbers = #tpu.dot_dimension_numbers<[1], [0], [0], [1], [0, 0, 1, 1], [], []>} : vector<16x32xbf16>, vector<32x64xbf16>, vector<16x64xf32> -> vector<16x64xf32>
    %c0_3 = arith.constant 0 : index
    %c0_4 = arith.constant 0 : index
    %4 = vector.load %arg5[%c0_3, %c0_4] : memref<1x64xf32, #tpu.memory_space<vmem>>, vector<1x64xf32>
    %5 = vector.broadcast %4 : vector<1x64xf32> to vector<16x64xf32>
    %6 = arith.addf %3, %5 : vector<16x64xf32>
    %c0_5 = arith.constant 0 : index
    %c0_6 = arith.constant 0 : index
    %7 = vector.load %arg6[%c0_5, %c0_6] : memref<16x64xf32, #tpu.memory_space<vmem>>, vector<16x64xf32>
    tpu.vector_store %arg6[%c0_5, %c0_6], %6 {strides = array<i32>} : memref<16x64xf32, #tpu.memory_space<vmem>>, vector<16x64xf32>,
    return
  }
  func.func @transform_0(%arg0: i32, %arg1: i32, %arg2: i32) -> (i32, i32) {
    %c0_i32 = arith.constant 0 : i32
    return %arg0, %arg2 : i32, i32
  }
  func.func @transform_1(%arg0: i32, %arg1: i32, %arg2: i32) -> (i32, i32) {
    %c0_i32 = arith.constant 0 : i32
    return %arg2, %arg1 : i32, i32
  }
  func.func @transform_2(%arg0: i32, %arg1: i32, %arg2: i32) -> (i32, i32) {
    %c0_i32 = arith.constant 0 : i32
    %c0_i32_0 = arith.constant 0 : i32
    return %c0_i32, %arg1 : i32, i32
  }
  func.func @transform_3(%arg0: i32, %arg1: i32, %arg2: i32) -> (i32, i32) {
    %c0_i32 = arith.constant 0 : i32
    return %arg0, %arg1 : i32, i32
  }
}

</mosaic_0001>

<bundles_post_ra>
// kernel: tpu_custom_call.1
= control target key start
LH: loop header
LB: loop body
LE: loop exit
PB: predicated region body
PF: predicated region fallthrough
CT: control target
= control target key end

     0   :  { %8 = vsyncpa [#allocation3], 0  ;;  %s308_s0 = inlined_call_operand.hbm [shape: f32[16,32], index: 0, kind: input, shape index: {}]   ;;  %s309_s1 = inlined_call_operand.hbm [shape: bf16[32,64], index: 1, kind: input, shape index: {}]   ;;  %s310_s2 = inlined_call_operand.vmem [shape: f32[1,64], index: 2, kind: input, shape index: {}]   ;;  %s311_s3 = inlined_call_operand.hbm [shape: f32[16,64], index: 3, kind: output, shape index: {}]  }
   0x1   :  { %9 = vsyncpa [#allocation6], 0 }
   0x2   :  { %10 = vsyncpa [#allocation4], 0  ;;  %s234_s12 = smov [#allocation2]   ;;  %s162_s16 = scalar_lea.hbm %s308_s0, 256 }
   0x3   :  { %s16_s13 = sshll.u32 %s234_s12, 4  ;;  %p163_p0 = scmp.ne.s32.totalorder %s308_s0, %s162_s16  ;;  %s17_s13 = int_to_ptr.vmem [resolvable:$true] %s16_s13 }
   0x4   :  { %p166_p1 = scmp.lt.u32.totalorder %s162_s16, %s308_s0 }
   0x6   :  { %p168_p2 = pnand %p166_p1, %p163_p0 }
   0x8   :  { %171 = shalt.err (!%p168_p2)
}
   0x9   :  { %s172_s21 = scalar_lea.vmem %s17_s13, 256  ;;  %p177_p4 = scmp.lt.s32.totalorder %s17_s13, %s17_s13 }
   0xa   :  { %p173_p3 = scmp.ne.s32.totalorder %s17_s13, %s172_s21  ;;  %p178_p5 = scmp.lt.s32.totalorder %s172_s21, %s172_s21 }
   0xc   :  { %p179_p6 = por %p178_p5, %p177_p4 }
   0xe   :  { %p180_p7 = pnand %p179_p6, %p173_p3 }
  0x10   :  { %183 = shalt.err (!%p180_p7)
}
  0x11   :  { %s235_s22 = smov 128   ;;  %s236_s23 = smov 8  }
  0x12   :  { %22 = dma.hbm_to_vmem [thread:$0]  %s308_s0, 256, %s17_s13, [#allocation3], %s235_s22, %s235_s22, %s236_s23  }
  0x13   :  { %s237_s26 = smov [#allocation5]   ;;  %s184_s30 = scalar_lea.hbm %s309_s1, 256 }
  0x14   :  { %s28_s27 = sshll.u32 %s237_s26, 4  ;;  %p185_p8 = scmp.ne.s32.totalorder %s309_s1, %s184_s30  ;;  %s29_s27 = int_to_ptr.vmem [resolvable:$true] %s28_s27 }
  0x15   :  { %p188_p9 = scmp.lt.u32.totalorder %s184_s30, %s309_s1 }
  0x17   :  { %p190_p10 = pnand %p188_p9, %p185_p8 }
  0x19   :  { %193 = shalt.err (!%p190_p10)
}
  0x1a   :  { %s194_s8 = scalar_lea.vmem %s29_s27, 256  ;;  %p199_p12 = scmp.lt.s32.totalorder %s29_s27, %s29_s27 }
  0x1b   :  { %p195_p11 = scmp.ne.s32.totalorder %s29_s27, %s194_s8  ;;  %p200_p13 = scmp.lt.s32.totalorder %s194_s8, %s194_s8 }
  0x1d   :  { %p201_p0 = por %p200_p13, %p199_p12 }
  0x1f   :  { %p202_p1 = pnand %p201_p0, %p195_p11 }
  0x21   :  { %205 = shalt.err (!%p202_p1)
}
  0x22   :  { %s238_s0 = smov 64   ;;  %s239_s9 = smov 4  }
  0x23   :  { %34 = dma.hbm_to_vmem [thread:$0]  %s309_s1, 256, %s29_s27, [#allocation6], %s238_s0, %s238_s0, %s239_s9  }
  0x24   :  { %228 = dma.done.wait [#allocation3], 256  }
  0x25   :  { %229 = vsyncadd [#allocation3], 4294967040 }
  0x26   :  { %230 = dma.done.wait [#allocation6], 256  }
  0x27   :  { %231 = vsyncadd [#allocation6], 4294967040  ;;  %v240_v0 = vmov 0.0   ;;  %vm241_vm0 = vmmov 0   ;;  %v160_v1 = vld [vmem:[#allocation5] sm:$0xff]   ;;  %v161_v2 = vld [vmem:[#allocation5 + $0x8] sm:$0xff]  }
  0x28   :  { %143 = vmatprep.subr.bf16.mxu0 %v240_v0  ;;  %147 = vmatprep.mubr.msk.bf16.mxu0 %vm241_vm0, %v240_v0  ;;  %v44_v3 = vld [vmem:[#allocation2] sm:$0xff]  ;;  %v45_v4 = vld [vmem:[#allocation2 + $0x8] sm:$0xff]  ;;  %vm70_vm1 = vcmask 261120   ;;  %vm115_vm2 = vcmask 523264   ;;  %s242_s13 = smov [#allocation7]  }
  0x29   :  { %144 = vmatpush3.bf16.msra.mxu0 %v160_v1  ;;  %v46_v5 = vpack.c.bf16 %v45_v4, %v44_v3  ;;  %v136_v6 = vld [vmem:[%s310_s2] ss:$0 sm:$0xff]  ;;  %s123_s14 = sshll.u32 %s242_s13, 4  ;;  %s124_s14 = int_to_ptr.vmem [resolvable:$true] %s123_s14 }
  0x2a   :  { %145 = vmatprep.subr.bf16.mxu0 %v240_v0  ;;  %s206_s15 = scalar_lea.vmem %s124_s14, 256  ;;  %p211_p3 = scmp.lt.s32.totalorder %s124_s14, %s124_s14 }
  0x2b   :  { %p207_p2 = scmp.ne.s32.totalorder %s124_s14, %s206_s15  ;;  %p212_p4 = scmp.lt.s32.totalorder %s206_s15, %s206_s15 }
  0x2d   :  { %146 = vmatpush3.bf16.msra.mxu0 %v161_v2  ;;  %p213_p5 = por %p212_p4, %p211_p3 }
  0x2f   :  { %p214_p6 = pnand %p213_p5, %p207_p2 }
  0x30   :  { %148 = vmatmul.mubr.msk.bf16.vlgmr.msra.gmra.mrb[0].mxu0 %vm70_vm1, %v46_v5 }
 0x103   :  { %v108_v7 = vpop.f32.mrb[0].mxu0 }
 0x104   :  { %v109_v8 = vadd.f32 %v136_v6, %v108_v7  ;;  %v149_v9 = vpop.f32.mrb[1].mxu0 }
 0x105   :  { %v111_v10 = vpop.f32.mrb[2].mxu0 }
 0x106   :  { %v112_v11 = vadd.f32 %v136_v6, %v111_v10  ;;  %v150_v12 = vpop.f32.mrb[3].mxu0  ;;  %116 = vst.msk [vmem:[#allocation7] sm:$0xff] %vm115_vm2, %v109_v8 }
 0x108   :  { %117 = vst.msk [vmem:[#allocation7 + $0x8] sm:$0xff] %vm115_vm2, %v112_v11 }
 0x109   :  { %217 = shalt.err (!%p214_p6)
}
 0x10a   :  { %s218_s17 = scalar_lea.hbm %s311_s3, 256 }
 0x10b   :  { %p219_p7 = scmp.ne.s32.totalorder %s311_s3, %s218_s17  ;;  %p222_p8 = scmp.lt.u32.totalorder %s218_s17, %s311_s3 }
 0x10d   :  { %p224_p9 = pnand %p222_p8, %p219_p7 }
 0x10f   :  { %227 = shalt.err (!%p224_p9)
}
 0x110   :  { %129 = dma.vmem_to_hbm [thread:$0]  %s124_s14, 256, %s311_s3, [#allocation4], %s235_s22, %s235_s22, %s236_s23  }
 0x111   :  { %232 = dma.done.wait [#allocation4], 256  }
 0x112   :  { %233 = vsyncadd [#allocation4], 4294967040 }
 0x113   :  { %133 = vsyncpa [#allocation3], 1 }
 0x114   :  { %134 = vsyncpa [#allocation6], 1 }
 0x115   :  { %135 = vsyncpa [#allocation4], 1 }

</bundles_post_ra>
